<compile_context>
chip_gen: v7x
topology: tpu7x:2x2x1
jax: 0.10.0
libtpu: 0.0.40
codegen_flags: <defaults>
</compile_context>

<pallas_src>
import functools
from typing import NamedTuple

import jax
import jax.numpy as jnp
from jax.experimental import pallas as pl
from jax.experimental.pallas import tpu as pltpu

BN_EPS = 1e-5


def _round_up(n, m):
    return ((n + m - 1) // m) * m


class SlabRows(NamedTuple):
    B1: int       # conv1 bias           (1 row, 12 lanes)
    B2: int       # conv2 bias           (1 row, 6 lanes)
    B3: int       # conv3 bias           (1 row, C lanes)
    BCOMB: int    # folded Fc/Fc1 bias   (1 row, 1 lane)
    WSUM: int     # (tap0+tap1+tap2)/E   (C rows, 12 lanes)
    W0N: int      # -tap0/E              (C rows, 12 lanes)
    W2N: int      # -tap2/E              (C rows, 12 lanes)
    W2: int       # conv2 weight^T       (12 rows, 6 lanes)
    W3: int       # conv3 weight^T       (6 rows, C lanes)
    GAMMA: int    # BN gamma, lane-broadcast (C rows, full width)
    BETA: int     # BN beta,  lane-broadcast (C rows, full width)
    WCOMB: int    # fc1W @ fcW reshaped  (C rows, E lanes)
    TOTAL: int


def _slab_rows(C):
    # 4 one-row vectors share the first (8,128) sublane tile; every multi-row
    # weight block starts on an 8-row boundary so in-kernel slices stay
    # tile-aligned (no sublane relayout on load).
    cpad = _round_up(C, 8)
    wsum = 8
    w0n = wsum + cpad
    w2n = w0n + cpad
    w2 = w2n + cpad
    w3 = w2 + _round_up(12, 8)
    gamma = w3 + _round_up(6, 8)
    beta = gamma + cpad
    wcomb = beta + cpad
    total = wcomb + cpad
    return SlabRows(B1=0, B2=1, B3=2, BCOMB=3, WSUM=wsum, W0N=w0n, W2N=w2n,
                    W2=w2, W3=w3, GAMMA=gamma, BETA=beta, WCOMB=wcomb,
                    TOTAL=total)


class SEDecoderPrepped(NamedTuple):
    slab: jax.Array      # (rows.TOTAL, W) packed small params
    C: int
    E: int
    W: int               # slab lane width (>= max(E, 12), multiple of 128)
    rows: SlabRows


def prepare_params(params, embed_dim):
    """One-time re-layout of PyTorch-layout params (hoisted out of the call path)."""
    (w1, b1, w2, b2, w3, b3, gamma, beta, fcW, fcb, fc1W, fc1b) = params
    C = w1.shape[1]
    E = int(embed_dim)
    F = fcW.shape[0]
    P = fc1W.shape[0]
    assert P == 1, "kernel implements prediction_num=1 (module default)"
    assert fcW.shape[1] == C * E
    W = _round_up(max(E, 12), 128)
    rows = _slab_rows(C)

    slab = jnp.zeros((rows.TOTAL, W), jnp.float32)
    slab = slab.at[rows.B1, :12].set(b1.astype(jnp.float32))
    slab = slab.at[rows.B2, :6].set(b2.astype(jnp.float32))
    slab = slab.at[rows.B3, :C].set(b3.astype(jnp.float32))

    # Conv(1,3) taps fused with AdaptiveAvgPool: sum tap + endpoint
    # corrections, with the 1/E average folded into the weights.
    w1f = w1.astype(jnp.float32)                               # (12, C, 3)
    wsum = jnp.transpose(w1f[:, :, 0] + w1f[:, :, 1] + w1f[:, :, 2]) / E  # (C, 12)
    w0n = -jnp.transpose(w1f[:, :, 0]) / E                      # (C, 12)
    w2n = -jnp.transpose(w1f[:, :, 2]) / E                      # (C, 12)
    slab = slab.at[rows.WSUM:rows.WSUM + C, :12].set(wsum)
    slab = slab.at[rows.W0N:rows.W0N + C, :12].set(w0n)
    slab = slab.at[rows.W2N:rows.W2N + C, :12].set(w2n)
    slab = slab.at[rows.W2:rows.W2 + 12, :6].set(jnp.transpose(w2).astype(jnp.float32))
    slab = slab.at[rows.W3:rows.W3 + 6, :C].set(jnp.transpose(w3).astype(jnp.float32))

    # BN affine pre-broadcast across lanes: row c holds gamma[c]/beta[c] in
    # every lane, so it applies to y (C on sublanes, E on lanes) with no
    # lane->sublane relayout in the kernel.
    slab = slab.at[rows.GAMMA:rows.GAMMA + C, :].set(
        jnp.broadcast_to(gamma.astype(jnp.float32)[:, None], (C, W)))
    slab = slab.at[rows.BETA:rows.BETA + C, :].set(
        jnp.broadcast_to(beta.astype(jnp.float32)[:, None], (C, W)))

    # Fc ∘ Fc1 fold (exact in real arithmetic: no nonlinearity between them).
    wcomb = (fc1W.astype(jnp.float32) @ fcW.astype(jnp.float32)).reshape(C, E)
    bcomb = fc1b.astype(jnp.float32) + fc1W.astype(jnp.float32) @ fcb.astype(jnp.float32)
    slab = slab.at[rows.WCOMB:rows.WCOMB + C, :E].set(wcomb)
    slab = slab.at[rows.BCOMB, 0].set(bcomb[0])

    return SEDecoderPrepped(slab=slab, C=C, E=E, W=W, rows=rows)


def _se_decoder_kernel(x_ref, slab_ref, out_ref, *, C, E, rows):
    x = x_ref[...]                                        # (B, C, E) f32
    B = x.shape[0]

    # ---- SE branch: Conv2d(C->12,(1,3),pad(0,1)) + AvgPool((1,1)) fused into
    # a column-sum matmul plus two endpoint corrections (no concat).  The
    # three projections are tiny and dependent; the MXU slot is otherwise
    # idle after the Fc fold, so latency-trivial dots are fine here.
    S = jnp.sum(x, axis=-1)                               # (B, C)
    x_first = x[:, :, 0]                                  # (B, C)
    x_last = x[:, :, E - 1]                               # (B, C)
    pooled = (
        jnp.dot(S, slab_ref[rows.WSUM:rows.WSUM + C, 0:12],
                preferred_element_type=jnp.float32)
        + jnp.dot(x_last, slab_ref[rows.W0N:rows.W0N + C, 0:12],
                  preferred_element_type=jnp.float32)
        + jnp.dot(x_first, slab_ref[rows.W2N:rows.W2N + C, 0:12],
                  preferred_element_type=jnp.float32)
        + slab_ref[rows.B1:rows.B1 + 1, 0:12])            # (B, 12)

    h = jnp.maximum(
        jnp.dot(pooled, slab_ref[rows.W2:rows.W2 + 12, 0:6],
                preferred_element_type=jnp.float32)
        + slab_ref[rows.B2:rows.B2 + 1, 0:6], 0.0)        # (B, 6)

    att = jax.nn.sigmoid(
        jnp.dot(h, slab_ref[rows.W3:rows.W3 + 6, 0:C],
                preferred_element_type=jnp.float32)
        + slab_ref[rows.B3:rows.B3 + 1, 0:C])             # (B, C)
    # TODO(synk): PyTorch forward print()s att_x[0] and torch.save()s intermediate
    # tensors; host-side I/O has no Pallas equivalent and is skipped.

    # ---- residual + channel attention + ReLU: relu(x + x*att) == relu(x*(1+att)).
    # (1+att)[:, :, None] is the single accepted small lane->sublane relayout.
    y = jnp.maximum(x * (1.0 + att)[:, :, None], 0.0)     # (B, C, E)

    # ---- BatchNorm2d: training-mode batch stats (biased var), two-pass for
    # numerical robustness.  gamma/beta are already lane-broadcast per channel.
    n = B * E
    mean = jnp.sum(jnp.sum(y, axis=2, keepdims=True), axis=0, keepdims=True) / n   # (1,C,1)
    d = y - mean
    var = jnp.sum(jnp.sum(d * d, axis=2, keepdims=True), axis=0, keepdims=True) / n
    gamma_b = slab_ref[rows.GAMMA:rows.GAMMA + C, 0:E]    # (C, E)
    beta_b = slab_ref[rows.BETA:rows.BETA + C, 0:E]       # (C, E)
    yn = d * (gamma_b[None] * jax.lax.rsqrt(var + BN_EPS)) + beta_b[None]

    # ---- Flatten + Fc + Fc1, folded at prep time into one (C, E) weight:
    # out = sum_{c,e} yn * wcomb + bcomb  (pure VPU multiply + reduce; no MXU,
    # no reshape across the (8,128) tile boundary, no fcw DMA).
    wcomb = slab_ref[rows.WCOMB:rows.WCOMB + C, 0:E]      # (C, E)
    acc = jnp.sum(jnp.sum(yn * wcomb[None], axis=2, keepdims=True), axis=1)  # (B, 1)
    out_ref[...] = acc + slab_ref[rows.BCOMB:rows.BCOMB + 1, 0:1]


def se_decoder_forward(x, prepped: SEDecoderPrepped):
    B, C, E = x.shape
    assert C == prepped.C and E == prepped.E
    rows = prepped.rows
    kernel = functools.partial(_se_decoder_kernel, C=C, E=E, rows=rows)
    vmem = pl.BlockSpec(memory_space=pltpu.MemorySpace.VMEM)
    bytes_accessed = (B * C * E + rows.TOTAL * prepped.W + B) * 4
    flops = (12 * B * C * E                       # elementwise passes + reduces
             + 6 * B * C * 12 + 2 * B * 12 * 6 + 2 * B * 6 * C)  # SE projections
    transcendentals = B * C + C                   # sigmoid + rsqrt
    return pl.pallas_call(
        kernel,
        out_shape=jax.ShapeDtypeStruct((B, 1), jnp.float32),
        in_specs=[vmem, vmem],
        out_specs=vmem,
        cost_estimate=pl.CostEstimate(flops=flops,
                                      transcendentals=transcendentals,
                                      bytes_accessed=bytes_accessed),
    )(x, prepped.slab)


def ref_forward(x, params):
    """Pure-JAX reference matching PyTorch semantics (conv / Fc / Fc1 un-fused)."""
    (w1, b1, w2, b2, w3, b3, gamma, beta, fcW, fcb, fc1W, fc1b) = params
    B, C, E = x.shape
    xp = jnp.pad(x, ((0, 0), (0, 0), (1, 1)))
    conv = (jnp.einsum('oc,bce->boe', w1[:, :, 0], xp[:, :, 0:E])
            + jnp.einsum('oc,bce->boe', w1[:, :, 1], xp[:, :, 1:E + 1])
            + jnp.einsum('oc,bce->boe', w1[:, :, 2], xp[:, :, 2:E + 2])
            + b1[None, :, None])
    pooled = conv.mean(-1)
    h = jax.nn.relu(pooled @ w2.T + b2)
    att = jax.nn.sigmoid(h @ w3.T + b3)
    y = jax.nn.relu(x + x * att[:, :, None])
    mean = y.mean(axis=(0, 2), keepdims=True)
    var = ((y - mean) ** 2).mean(axis=(0, 2), keepdims=True)
    y = (y - mean) / jnp.sqrt(var + BN_EPS)
    y = y * gamma[None, :, None] + beta[None, :, None]
    z = y.reshape(B, C * E) @ fcW.T + fcb
    return z @ fc1W.T + fc1b


def init_params(key, C=2, E=128, F=96, P=1):
    """Deterministic synthetic parameters (PyTorch layouts)."""
    ks = jax.random.split(key, 10)
    w1 = 0.1 * jax.random.normal(ks[0], (12, C, 3), jnp.float32)   # Conv2d(C,12,(1,3))
    b1 = 0.1 * jax.random.normal(ks[1], (12,), jnp.float32)
    w2 = 0.1 * jax.random.normal(ks[2], (6, 12), jnp.float32)      # Conv2d(12,6,1x1)
    b2 = 0.1 * jax.random.normal(ks[3], (6,), jnp.float32)
    w3 = 0.1 * jax.random.normal(ks[4], (C, 6), jnp.float32)       # Conv2d(6,C,1x1)
    b3 = 0.1 * jax.random.normal(ks[5], (C,), jnp.float32)
    gamma = jnp.ones((C,), jnp.float32)                            # BatchNorm2d affine
    beta = jnp.zeros((C,), jnp.float32)
    fcW = 0.05 * jax.random.normal(ks[6], (F, C * E), jnp.float32)  # Fc
    fcb = 0.05 * jax.random.normal(ks[7], (F,), jnp.float32)
    fc1W = 0.05 * jax.random.normal(ks[8], (P, F), jnp.float32)     # Fc1
    fc1b = 0.05 * jax.random.normal(ks[9], (P,), jnp.float32)
    return (w1, b1, w2, b2, w3, b3, gamma, beta, fcW, fcb, fc1W, fc1b)


if __name__ == "__main__":
    B, C, E, F, P = 2, 2, 128, 96, 1   # batch, cell_num, embed_dim, decoderFc_size, prediction_num
    key = jax.random.PRNGKey(0)
    kx, kp = jax.random.split(key)
    x = jax.random.normal(kx, (B, C, E), jnp.float32)   # == NCHW (B, C, 1, E) squeezed
    params = init_params(kp, C=C, E=E, F=F, P=P)

    prepped = prepare_params(params, embed_dim=E)       # one-time layout, hoisted
    out = se_decoder_forward(x, prepped)
    out = jax.block_until_ready(out)

    ref = ref_forward(x, params)
    assert out.shape == (B, P), out.shape
    if not jnp.allclose(out, ref, rtol=2e-3, atol=2e-3):
        raise AssertionError(f"mismatch: kernel={out} ref={ref}")
    print("KERNEL_OK")
</pallas_src>

<mosaic_0001>
module attributes {stable_mosaic.version = 11 : i64} {
  func.func @_se_decoder_kernel(%arg0: memref<2x2x128xf32, #tpu.memory_space<vmem>>, %arg1: memref<80x128xf32, #tpu.memory_space<vmem>>, %arg2: memref<2x1xf32, #tpu.memory_space<vmem>>) attributes {dimension_semantics = [], scalar_prefetch = 0 : i64, scratch_operands = 0 : i64, tpu.core_type = #tpu.core_type<tc>} {
    %c0 = arith.constant 0 : index
    %c0_0 = arith.constant 0 : index
    %c0_1 = arith.constant 0 : index
    %0 = vector.load %arg0[%c0, %c0_0, %c0_1] : memref<2x2x128xf32, #tpu.memory_space<vmem>>, vector<2x2x128xf32>
    %cst = arith.constant dense<0.000000e+00> : vector<2x2xf32>
    %1 = vector.multi_reduction <add>, %0, %cst [2] : vector<2x2x128xf32> to vector<2x2xf32>
    %2 = vector.extract_strided_slice %0 {offsets = [0, 0, 0], sizes = [2, 2, 1], strides = [1, 1, 1]} : vector<2x2x128xf32> to vector<2x2x1xf32>
    %3 = vector.shape_cast %2 : vector<2x2x1xf32> to vector<2x2xf32>
    %4 = vector.extract_strided_slice %0 {offsets = [0, 0, 127], sizes = [2, 2, 1], strides = [1, 1, 1]} : vector<2x2x128xf32> to vector<2x2x1xf32>
    %5 = vector.shape_cast %4 : vector<2x2x1xf32> to vector<2x2xf32>
    %c8 = arith.constant 8 : index
    %c0_2 = arith.constant 0 : index
    %6 = vector.load %arg1[%c8, %c0_2] : memref<80x128xf32, #tpu.memory_space<vmem>>, vector<2x12xf32>
    %cst_3 = arith.constant dense<0.000000e+00> : vector<2x12xf32>
    %7 = tpu.matmul %1, %6, %cst_3 {dimension_numbers = #tpu.dot_dimension_numbers<[1], [0], [0], [1], [0, 0, 1, 1], [], []>} : vector<2x2xf32>, vector<2x12xf32>, vector<2x12xf32> -> vector<2x12xf32>
    %c16 = arith.constant 16 : index
    %c0_4 = arith.constant 0 : index
    %8 = vector.load %arg1[%c16, %c0_4] : memref<80x128xf32, #tpu.memory_space<vmem>>, vector<2x12xf32>
    %cst_5 = arith.constant dense<0.000000e+00> : vector<2x12xf32>
    %9 = tpu.matmul %5, %8, %cst_5 {dimension_numbers = #tpu.dot_dimension_numbers<[1], [0], [0], [1], [0, 0, 1, 1], [], []>} : vector<2x2xf32>, vector<2x12xf32>, vector<2x12xf32> -> vector<2x12xf32>
    %10 = arith.addf %7, %9 : vector<2x12xf32>
    %c24 = arith.constant 24 : index
    %c0_6 = arith.constant 0 : index
    %11 = vector.load %arg1[%c24, %c0_6] : memref<80x128xf32, #tpu.memory_space<vmem>>, vector<2x12xf32>
    %cst_7 = arith.constant dense<0.000000e+00> : vector<2x12xf32>
    %12 = tpu.matmul %3, %11, %cst_7 {dimension_numbers = #tpu.dot_dimension_numbers<[1], [0], [0], [1], [0, 0, 1, 1], [], []>} : vector<2x2xf32>, vector<2x12xf32>, vector<2x12xf32> -> vector<2x12xf32>
    %13 = arith.addf %10, %12 : vector<2x12xf32>
    %c0_8 = arith.constant 0 : index
    %c0_9 = arith.constant 0 : index
    %14 = vector.load %arg1[%c0_8, %c0_9] : memref<80x128xf32, #tpu.memory_space<vmem>>, vector<1x12xf32>
    %15 = vector.broadcast %14 : vector<1x12xf32> to vector<2x12xf32>
    %16 = arith.addf %13, %15 : vector<2x12xf32>
    %c32 = arith.constant 32 : index
    %c0_10 = arith.constant 0 : index
    %17 = vector.load %arg1[%c32, %c0_10] : memref<80x128xf32, #tpu.memory_space<vmem>>, vector<12x6xf32>
    %cst_11 = arith.constant dense<0.000000e+00> : vector<2x6xf32>
    %18 = tpu.matmul %16, %17, %cst_11 {dimension_numbers = #tpu.dot_dimension_numbers<[1], [0], [0], [1], [0, 0, 1, 1], [], []>} : vector<2x12xf32>, vector<12x6xf32>, vector<2x6xf32> -> vector<2x6xf32>
    %c1 = arith.constant 1 : index
    %c0_12 = arith.constant 0 : index
    %19 = vector.load %arg1[%c1, %c0_12] : memref<80x128xf32, #tpu.memory_space<vmem>>, vector<1x6xf32>
    %20 = vector.broadcast %19 : vector<1x6xf32> to vector<2x6xf32>
    %21 = arith.addf %18, %20 : vector<2x6xf32>
    %cst_13 = arith.constant 0.000000e+00 : f32
    %22 = vector.broadcast %cst_13 : f32 to vector<2x6xf32>
    %23 = arith.maximumf %21, %22 : vector<2x6xf32>
    %c48 = arith.constant 48 : index
    %c0_14 = arith.constant 0 : index
    %24 = vector.load %arg1[%c48, %c0_14] : memref<80x128xf32, #tpu.memory_space<vmem>>, vector<6x2xf32>
    %cst_15 = arith.constant dense<0.000000e+00> : vector<2x2xf32>
    %25 = tpu.matmul %23, %24, %cst_15 {dimension_numbers = #tpu.dot_dimension_numbers<[1], [0], [0], [1], [0, 0, 1, 1], [], []>} : vector<2x6xf32>, vector<6x2xf32>, vector<2x2xf32> -> vector<2x2xf32>
    %c2 = arith.constant 2 : index
    %c0_16 = arith.constant 0 : index
    %26 = vector.load %arg1[%c2, %c0_16] : memref<80x128xf32, #tpu.memory_space<vmem>>, vector<1x2xf32>
    %27 = vector.broadcast %26 : vector<1x2xf32> to vector<2x2xf32>
    %28 = arith.addf %25, %27 : vector<2x2xf32>
    %29 = arith.negf %28 : vector<2x2xf32>
    %30 = math.exp %29 : vector<2x2xf32>
    %cst_17 = arith.constant 1.000000e+00 : f32
    %31 = vector.broadcast %cst_17 : f32 to vector<2x2xf32>
    %32 = arith.addf %31, %30 : vector<2x2xf32>
    %33 = arith.divf %31, %32 : vector<2x2xf32>
    %cst_18 = arith.constant 1.000000e+00 : f32
    %34 = vector.broadcast %cst_18 : f32 to vector<2x2xf32>
    %35 = arith.addf %34, %33 : vector<2x2xf32>
    %36 = vector.shape_cast %35 : vector<2x2xf32> to vector<2x2x1xf32>
    %37 = vector.broadcast %36 : vector<2x2x1xf32> to vector<2x2x128xf32>
    %38 = arith.mulf %0, %37 : vector<2x2x128xf32>
    %cst_19 = arith.constant 0.000000e+00 : f32
    %39 = vector.broadcast %cst_19 : f32 to vector<2x2x128xf32>
    %40 = arith.maximumf %38, %39 : vector<2x2x128xf32>
    %cst_20 = arith.constant dense<0.000000e+00> : vector<2x2xf32>
    %41 = vector.multi_reduction <add>, %40, %cst_20 [2] : vector<2x2x128xf32> to vector<2x2xf32>
    %42 = vector.shape_cast %41 : vector<2x2xf32> to vector<2x2x1xf32>
    %cst_21 = arith.constant dense<0.000000e+00> : vector<2x1xf32>
    %43 = vector.multi_reduction <add>, %42, %cst_21 [0] : vector<2x2x1xf32> to vector<2x1xf32>
    %44 = vector.shape_cast %43 : vector<2x1xf32> to vector<1x2x1xf32>
    %cst_22 = arith.constant 2.560000e+02 : f32
    %45 = vector.broadcast %cst_22 : f32 to vector<1x2x1xf32>
    %46 = arith.divf %44, %45 : vector<1x2x1xf32>
    %47 = vector.broadcast %46 : vector<1x2x1xf32> to vector<2x2x128xf32>
    %48 = arith.subf %40, %47 : vector<2x2x128xf32>
    %49 = arith.mulf %48, %48 : vector<2x2x128xf32>
    %cst_23 = arith.constant dense<0.000000e+00> : vector<2x2xf32>
    %50 = vector.multi_reduction <add>, %49, %cst_23 [2] : vector<2x2x128xf32> to vector<2x2xf32>
    %51 = vector.shape_cast %50 : vector<2x2xf32> to vector<2x2x1xf32>
    %cst_24 = arith.constant dense<0.000000e+00> : vector<2x1xf32>
    %52 = vector.multi_reduction <add>, %51, %cst_24 [0] : vector<2x2x1xf32> to vector<2x1xf32>
    %53 = vector.shape_cast %52 : vector<2x1xf32> to vector<1x2x1xf32>
    %cst_25 = arith.constant 2.560000e+02 : f32
    %54 = vector.broadcast %cst_25 : f32 to vector<1x2x1xf32>
    %55 = arith.divf %53, %54 : vector<1x2x1xf32>
    %c56 = arith.constant 56 : index
    %c0_26 = arith.constant 0 : index
    %56 = vector.load %arg1[%c56, %c0_26] : memref<80x128xf32, #tpu.memory_space<vmem>>, vector<2x128xf32>
    %c64 = arith.constant 64 : index
    %c0_27 = arith.constant 0 : index
    %57 = vector.load %arg1[%c64, %c0_27] : memref<80x128xf32, #tpu.memory_space<vmem>>, vector<2x128xf32>
    %58 = vector.shape_cast %56 : vector<2x128xf32> to vector<1x2x128xf32>
    %cst_28 = arith.constant 9.99999974E-6 : f32
    %59 = vector.broadcast %cst_28 : f32 to vector<1x2x1xf32>
    %60 = arith.addf %55, %59 : vector<1x2x1xf32>
    %61 = math.rsqrt %60 : vector<1x2x1xf32>
    %62 = vector.broadcast %61 : vector<1x2x1xf32> to vector<1x2x128xf32>
    %63 = arith.mulf %58, %62 : vector<1x2x128xf32>
    %64 = vector.broadcast %63 : vector<1x2x128xf32> to vector<2x2x128xf32>
    %65 = arith.mulf %48, %64 : vector<2x2x128xf32>
    %66 = vector.shape_cast %57 : vector<2x128xf32> to vector<1x2x128xf32>
    %67 = vector.broadcast %66 : vector<1x2x128xf32> to vector<2x2x128xf32>
    %68 = arith.addf %65, %67 : vector<2x2x128xf32>
    %c72 = arith.constant 72 : index
    %c0_29 = arith.constant 0 : index
    %69 = vector.load %arg1[%c72, %c0_29] : memref<80x128xf32, #tpu.memory_space<vmem>>, vector<2x128xf32>
    %70 = vector.shape_cast %69 : vector<2x128xf32> to vector<1x2x128xf32>
    %71 = vector.broadcast %70 : vector<1x2x128xf32> to vector<2x2x128xf32>
    %72 = arith.mulf %68, %71 : vector<2x2x128xf32>
    %cst_30 = arith.constant dense<0.000000e+00> : vector<2x2xf32>
    %73 = vector.multi_reduction <add>, %72, %cst_30 [2] : vector<2x2x128xf32> to vector<2x2xf32>
    %74 = vector.shape_cast %73 : vector<2x2xf32> to vector<2x2x1xf32>
    %cst_31 = arith.constant dense<0.000000e+00> : vector<2x1xf32>
    %75 = vector.multi_reduction <add>, %74, %cst_31 [1] : vector<2x2x1xf32> to vector<2x1xf32>
    %c3 = arith.constant 3 : index
    %c0_32 = arith.constant 0 : index
    %76 = vector.load %arg1[%c3, %c0_32] : memref<80x128xf32, #tpu.memory_space<vmem>>, vector<1x1xf32>
    %77 = vector.broadcast %76 : vector<1x1xf32> to vector<2x1xf32>
    %78 = arith.addf %75, %77 : vector<2x1xf32>
    %c0_33 = arith.constant 0 : index
    %c0_34 = arith.constant 0 : index
    %79 = vector.load %arg2[%c0_33, %c0_34] : memref<2x1xf32, #tpu.memory_space<vmem>>, vector<2x1xf32>
    tpu.vector_store %arg2[%c0_33, %c0_34], %78 {strides = array<i32>} : memref<2x1xf32, #tpu.memory_space<vmem>>, vector<2x1xf32>,
    return
  }
}

</mosaic_0001>

<bundles_post_ra>
// kernel: tpu_custom_call.1
= control target key start
LH: loop header
LB: loop body
LE: loop exit
PB: predicated region body
PF: predicated region fallthrough
CT: control target
= control target key end

     0   :  { %7 = vsyncpa [#allocation3], 0  ;;  %s828_s0 = inlined_call_operand.hbm [shape: f32[2,2,128], index: 0, kind: input, shape index: {}]   ;;  %s829_s1 = inlined_call_operand.hbm [shape: f32[80,128], index: 1, kind: input, shape index: {}]   ;;  %s830_s2 = inlined_call_operand.vmem [shape: f32[2,1], index: 2, kind: output, shape index: {}]  }
   0x1   :  { %8 = vsyncpa [#allocation5], 0  ;;  %s728_s9 = smov [#allocation2]   ;;  %s680_s13 = scalar_lea.hbm %s828_s0, 64 }
   0x2   :  { %s14_s10 = sshll.u32 %s728_s9, 4  ;;  %p681_p0 = scmp.ne.s32.totalorder %s828_s0, %s680_s13  ;;  %s15_s10 = int_to_ptr.vmem [resolvable:$true] %s14_s10 }
   0x3   :  { %p684_p1 = scmp.lt.u32.totalorder %s680_s13, %s828_s0 }
   0x5   :  { %p686_p2 = pnand %p684_p1, %p681_p0 }
   0x7   :  { %689 = shalt.err (!%p686_p2)
}
   0x8   :  { %s690_s18 = scalar_lea.vmem %s15_s10, 64  ;;  %p695_p4 = scmp.lt.s32.totalorder %s15_s10, %s15_s10 }
   0x9   :  { %p691_p3 = scmp.ne.s32.totalorder %s15_s10, %s690_s18  ;;  %p696_p5 = scmp.lt.s32.totalorder %s690_s18, %s690_s18 }
   0xb   :  { %p697_p6 = por %p696_p5, %p695_p4 }
   0xd   :  { %p698_p7 = pnand %p697_p6, %p691_p3 }
   0xf   :  { %701 = shalt.err (!%p698_p7)
}
  0x10   :  { %s729_s19 = smov 32   ;;  %s730_s20 = smov 2  }
  0x11   :  { %20 = dma.hbm_to_vmem [thread:$0]  %s828_s0, 64, %s15_s10, [#allocation3], %s729_s19, %s729_s19, %s730_s20  }
  0x12   :  { %s731_s23 = smov [#allocation4]   ;;  %s702_s27 = scalar_lea.hbm %s829_s1, 1280 }
  0x13   :  { %s26_s24 = sshll.u32 %s731_s23, 4  ;;  %p703_p8 = scmp.ne.s32.totalorder %s829_s1, %s702_s27  ;;  %s27_s24 = int_to_ptr.vmem [resolvable:$true] %s26_s24 }
  0x14   :  { %p706_p9 = scmp.lt.u32.totalorder %s702_s27, %s829_s1 }
  0x16   :  { %p708_p10 = pnand %p706_p9, %p703_p8 }
  0x18   :  { %711 = shalt.err (!%p708_p10)
}
  0x19   :  { %s712_s4 = scalar_lea.vmem %s27_s24, 1280  ;;  %p717_p12 = scmp.lt.s32.totalorder %s27_s24, %s27_s24 }
  0x1a   :  { %p713_p11 = scmp.ne.s32.totalorder %s27_s24, %s712_s4  ;;  %p718_p13 = scmp.lt.s32.totalorder %s712_s4, %s712_s4 }
  0x1c   :  { %p719_p0 = por %p718_p13, %p717_p12 }
  0x1e   :  { %p720_p1 = pnand %p719_p0, %p713_p11 }
  0x20   :  { %723 = shalt.err (!%p720_p1)
}
  0x21   :  { %s732_s0 = smov 128   ;;  %s733_s5 = smov 8  }
  0x22   :  { %32 = dma.hbm_to_vmem [thread:$0]  %s829_s1, 1280, %s27_s24, [#allocation5], %s732_s0, %s732_s0, %s733_s5  }
  0x23   :  { %724 = dma.done.wait [#allocation3], 64  }
  0x24   :  { %725 = vsyncadd [#allocation3], 4294967232 }
  0x25   :  { %726 = dma.done.wait [#allocation5], 1280  }
  0x26   :  { %727 = vsyncadd [#allocation5], 4294966016  ;;  %v734_v0 = vmov 127   ;;  %v735_v1 = vmov 0   ;;  %vm41_vm0 = vcmask 1041408   ;;  %v736_v6 = vmov 0.0  }
  0x27   :  { %671 = vset.pattern.permute.xlu1 %v734_v0  ;;  %672 = vset.pattern.permute.xlu0 %v735_v1  ;;  %v779_v2 = vld [vmem:[#allocation2] sm:$0x3]  ;;  %v781_v3 = vld [vmem:[#allocation2 + $0x2] sm:$0x3]  ;;  %v49_v7 = vld [vmem:[#allocation4 + $0x10] sm:$0x3]  ;;  %v58_v9 = vlaneseq }
  0x28   :  { %v42_v4 = vsel %vm41_vm0, %v779_v2, 0.0  ;;  %53 = vperm.xlu1 %671, %v779_v2   ;;  %v45_v5 = vsel %vm41_vm0, %v781_v3, 0.0  ;;  %628 = vmatprep.subr.mxu0 %v736_v6  ;;  %vm737_vm1 = vmmov 0   ;;  %v48_v8 = vld [vmem:[#allocation4 + $0x8] sm:$0x3]  ;;  %vm68_vm2 = vcmask 1041409  }
  0x29   :  { %43 = vadd.xlane.f32.xlu0 %v42_v4  ;;  %633 = vmatprep.subr.mxu1 %v736_v6  ;;  %v59_v10 = vand.u32 127, %v58_v9  ;;  %v795_v11 = vshrl.u32 %v58_v9, 7  ;;  %vm70_vm3 = vcmask 15360   ;;  %v232_v17 = vld [vmem:[#allocation4 + $0x18] sm:$0x3]  ;;  %v330_v29 = vld [vmem:[#allocation4 + $0x20] sm:$0xff] }
  0x2a   :  { %629 = vmatpush3.msk.msra.mxu0 %vm41_vm0, %v49_v7  ;;  %630 = vmatprep.mubr.msk.f32.mxu0 %vm737_vm1, %v736_v6  ;;  %v331_v30 = vld [vmem:[#allocation4 + $0x28] sm:$0xf]  ;;  %vm341_vm4 = vcmask 1043456   ;;  %v738_v32 = vmov 0.0|0.0   ;;  %vm739_vm5 = vmmov 1   ;;  %vm337_vm7 = vcmask 97280  }
  0x2b   :  { %634 = vmatpush3.msk.msra.mxu1 %vm41_vm0, %v48_v8  ;;  %635 = vmatprep.mubr.msk.f32.mxu1 %vm737_vm1, %v736_v6  ;;  %v62_v13 = vsub.s32 %v59_v10, %v795_v11  ;;  %v656_v31 = vpack.c.bf16 %v331_v30, %v330_v29  ;;  %vm657_vm6 = vmpackc.low %vm341_vm4, %vm739_vm5  ;;  %v608_v39 = vld [vmem:[#allocation4] ss:$0 sm:$0xff]  ;;  %v416_v43 = vld [vmem:[#allocation4 + $0x30] sm:$0x3f]  ;;  %vm426_vm8 = vcmask 1045504   ;;  %vm422_vm9 = vcmask 48128  }
  0x2c   :  { %56 = vperm.xlu1 %671, %v781_v3   ;;  %638 = vmatprep.subr.mxu0 %v736_v6  ;;  %v609_v44 = vld [vmem:[#allocation4 + $0x1] ss:$0 sm:$0xff]  ;;  %v612_v49 = vld [vmem:[#allocation4 + $0x2] ss:$0 sm:$0xff]  ;;  %v509_v56 = vsub.s32 0, %v795_v11  ;;  %v516_v60 = vsub.s32 1, %v795_v11 }
  0x2d   :  { %46 = vadd.xlane.f32.xlu0 %v45_v5  ;;  %655 = vmatprep.subr.bf16.mxu1 %v738_v32  ;;  %vm594_vm10 = vcmask 1024  }
  0x30   :  { %673 = vset.pattern.permute.xlu1 %v735_v1 }
  0x31   :  { %237 = vperm.xlu1 %673, %v781_v3  }
  0x43   :  { %234 = vperm.xlu0 %672, %v779_v2  }
  0xa7   :  { %v54_v12 = vpop.permute.xlu1 %53 }
  0xa8   :  { %v63_v14 = vrot.slane %v54_v12, %v62_v13 }
  0xab   :  { %v57_v15 = vpop.permute.xlu1 %56 }
  0xac   :  { %v67_v16 = vrot.slane %v57_v15, %v62_v13 }
  0xae   :  { %v69_v18 = vsel %vm68_vm2, %v67_v16, %v63_v14 }
  0xaf   :  { %631 = vmatmul.mubr.msk.f32.vlgmr.msra.gmra.mrb[0].mxu0 %vm70_vm3, %v69_v18 }
  0xb0   :  { %639 = vmatpush3.msk.msra.mxu0 %vm41_vm0, %v232_v17  ;;  %640 = vmatprep.mubr.msk.f32.mxu0 %vm737_vm1, %v736_v6  ;;  %v238_v24 = vpop.permute.xlu1 %237 }
  0xb1   :  { %650 = vmatprep.subr.mxu0 %v736_v6  ;;  %v246_v25 = vrot.slane %v238_v24, %v62_v13 }
  0xb6   :  { %v44_v19 = vpop.xlane.xlu0 %43 }
  0xb7   :  { %v151_v21 = vrot.slane %v44_v19, %v62_v13 }
  0xba   :  { %v47_v20 = vpop.xlane.xlu0 %46 }
  0xbb   :  { %v155_v22 = vrot.slane %v47_v20, %v62_v13 }
  0xbd   :  { %v156_v23 = vsel %vm68_vm2, %v155_v22, %v151_v21 }
  0xbe   :  { %636 = vmatmul.mubr.msk.f32.vlgmr.msra.gmra.mrb[0].mxu1 %vm70_vm3, %v156_v23 }
  0xbf   :  { %647 = vmatprep.mubr.msk.f32.mxu1 %vm737_vm1, %v736_v6  ;;  %658 = vmatpush3.bf16.msk.msra.mxu1 %vm657_vm6, %v656_v31  ;;  %v559_v31 = vld [vmem:[#allocation4 + $0x48] sm:$0x3] }
  0xc2   :  { %v235_v26 = vpop.permute.xlu0 %234 }
  0xc3   :  { %v242_v27 = vrot.slane %v235_v26, %v62_v13 }
  0xc5   :  { %v247_v28 = vsel %vm68_vm2, %v246_v25, %v242_v27  ;;  %v550_v25 = vld [vmem:[#allocation4 + $0x38] sm:$0x3] }
  0xc6   :  { %641 = vmatmul.mubr.msk.f32.vlgmr.msra.gmra.mrb[2].mxu0 %vm70_vm3, %v247_v28  ;;  %v551_v28 = vld [vmem:[#allocation4 + $0x40] sm:$0x3] }
  0xc7   :  { %652 = vmatprep.mubr.msk.f32.mxu0 %vm737_vm1, %v736_v6  ;;  %651 = vmatpush3.msk.msra.mxu0 %vm426_vm8, %v416_v43 }
 0x182   :  { %v142_v33 = vpop.f32.mrb[0].mxu0 }
 0x183   :  { %v632_v34 = vpop.f32.mrb[1].mxu0 }
 0x191   :  { %v228_v35 = vpop.f32.mrb[0].mxu1 }
 0x192   :  { %v229_v36 = vadd.f32 %v228_v35, %v142_v33  ;;  %v637_v37 = vpop.f32.mrb[1].mxu1 }
 0x199   :  { %v319_v38 = vpop.f32.mrb[2].mxu0 }
 0x19a   :  { %v323_v40 = vadd.f32 %v319_v38, %v229_v36  ;;  %v642_v41 = vpop.f32.mrb[3].mxu0 }
 0x19c   :  { %v329_v42 = vadd.f32 %v608_v39, %v323_v40 }
 0x19e   :  { %648 = vmatmul.mubr.msk.f32.vlgmr.msra.gmra.mrb[2].mxu1 %vm337_vm7, %v329_v42 }
 0x271   :  { %v411_v45 = vpop.f32.mrb[2].mxu1 }
 0x272   :  { %v412_v46 = vadd.f32 %v609_v44, %v411_v45  ;;  %v649_v47 = vpop.f32.mrb[3].mxu1 }
 0x274   :  { %v415_v48 = vmax.f32 %v412_v46, 0.0 }
 0x276   :  { %653 = vmatmul.mubr.msk.f32.vlgmr.msra.gmra.mrb[4].mxu0 %vm422_vm9, %v415_v48 }
 0x349   :  { %v496_v50 = vpop.f32.mrb[4].mxu0 }
 0x34a   :  { %v497_v51 = vadd.f32 %v612_v49, %v496_v50  ;;  %v654_v52 = vpop.f32.mrb[5].mxu0  ;;  %v616_v50 = vld [vmem:[#allocation4 + $0x3] ss:$0 sm:$0xff] }
 0x34c   :  { %v615_v53 = vmul.f32 -1.442695, %v497_v51 }
 0x34e   :  { %674 = vpow2.f32 %v615_v53 }
 0x358   :  { %v675_v54 = vpop.eup %674 }
 0x359   :  { %v503_v55 = vadd.f32 1.0, %v675_v54 }
 0x35b   :  { %676 = vrcp.f32 %v503_v55 }
 0x365   :  { %v677_v57 = vpop.eup %676 }
 0x366   :  { %v506_v58 = vadd.f32 1.0, %v677_v57 }
 0x368   :  { %v510_v59 = vrot.slane %v506_v58, %v509_v56  ;;  %v517_v61 = vrot.slane %v506_v58, %v516_v60 }
 0x36a   :  { %512 = vbcast.lane.b32.xlu1 %v510_v59, 256 }
 0x36e   :  { %519 = vbcast.lane.b32.xlu1 %v517_v61, 256 }
 0x3dc   :  { %v513_v62 = vpop.permute.xlu1 %512 }
 0x3dd   :  { %v521_v63 = vmul.f32 %v513_v62, %v779_v2 }
 0x3df   :  { %v523_v0 = vmax.f32 %v521_v63, 0.0 }
 0x3e0   :  { %v520_v1 = vpop.permute.xlu1 %519 }
 0x3e1   :  { %v522_v4 = vmul.f32 %v520_v1, %v781_v3  ;;  %v525_v5 = vsel %vm41_vm0, %v523_v0, 0.0 }
 0x3e2   :  { %526 = vadd.xlane.f32.xlu1 %v525_v5 }
 0x3e3   :  { %v524_v6 = vmax.f32 %v522_v4, 0.0 }
 0x3e5   :  { %v528_v7 = vsel %vm41_vm0, %v524_v6, 0.0 }
 0x3e6   :  { %529 = vadd.xlane.f32.xlu0 %v528_v7 }
 0x46f   :  { %v527_v8 = vpop.xlane.xlu1 %526 }
 0x470   :  { %v531_v10 = vsel %vm41_vm0, %v527_v8, 0.0 }
 0x473   :  { %v530_v9 = vpop.xlane.xlu0 %529 }
 0x474   :  { %v532_v11 = vsel %vm41_vm0, %v530_v9, 0.0 }
 0x475   :  { %v533_v12 = vadd.f32 %v532_v11, %v531_v10 }
 0x477   :  { %v535_v13 = vmul.f32 0.00390625, %v533_v12 }
 0x479   :  { %v536_v2 = vsub.f32 %v523_v0, %v535_v13  ;;  %v537_v14 = vsub.f32 %v524_v6, %v535_v13 }
 0x47b   :  { %v538_v15 = vmul.f32 %v536_v2, %v536_v2  ;;  %v539_v16 = vmul.f32 %v537_v14, %v537_v14 }
 0x47d   :  { %v540_v3 = vsel %vm41_vm0, %v538_v15, 0.0  ;;  %v543_v17 = vsel %vm41_vm0, %v539_v16, 0.0 }
 0x47e   :  { %541 = vadd.xlane.f32.xlu1 %v540_v3 }
 0x482   :  { %544 = vadd.xlane.f32.xlu1 %v543_v17 }
 0x50b   :  { %v542_v18 = vpop.xlane.xlu1 %541 }
 0x50c   :  { %v546_v20 = vsel %vm41_vm0, %v542_v18, 0.0 }
 0x50f   :  { %v545_v19 = vpop.xlane.xlu1 %544 }
 0x510   :  { %v547_v21 = vsel %vm41_vm0, %v545_v19, 0.0 }
 0x511   :  { %v548_v22 = vadd.f32 %v547_v21, %v546_v20 }
 0x513   :  { %v549_v23 = vmul.f32 0.00390625, %v548_v22 }
 0x515   :  { %v552_v24 = vadd.f32 1e-05, %v549_v23 }
 0x517   :  { %678 = vrsqrt.f32 %v552_v24 }
 0x521   :  { %v679_v26 = vpop.eup %678 }
 0x522   :  { %v554_v27 = vmul.f32 %v679_v26, %v550_v25 }
 0x524   :  { %v556_v29 = vmul.f32 %v554_v27, %v537_v14  ;;  %v555_v30 = vmul.f32 %v554_v27, %v536_v2 }
 0x526   :  { %v558_v32 = vadd.f32 %v556_v29, %v551_v28  ;;  %v557_v33 = vadd.f32 %v555_v30, %v551_v28 }
 0x528   :  { %v561_v34 = vmul.f32 %v559_v31, %v558_v32  ;;  %v560_v36 = vmul.f32 %v559_v31, %v557_v33 }
 0x52a   :  { %v565_v35 = vsel %vm41_vm0, %v561_v34, 0.0  ;;  %v562_v37 = vsel %vm41_vm0, %v560_v36, 0.0 }
 0x52b   :  { %566 = vadd.xlane.f32.xlu1 %v565_v35 }
 0x52f   :  { %563 = vadd.xlane.f32.xlu1 %v562_v37 }
 0x5b8   :  { %v567_v38 = vpop.xlane.xlu1 %566 }
 0x5b9   :  { %v575_v39 = vsel %vm41_vm0, %v567_v38, 0.0 }
 0x5ba   :  { %v576_v40 = vrot.slane %v575_v39, 4 }
 0x5bc   :  { %v577_v41 = vadd.f32 %v576_v40, %v575_v39  ;;  %v564_v42 = vpop.xlane.xlu1 %563 }
 0x5bd   :  { %v568_v43 = vsel %vm41_vm0, %v564_v42, 0.0 }
 0x5be   :  { %v578_v44 = vrot.slane %v577_v41, 2  ;;  %v569_v45 = vrot.slane %v568_v43, 4 }
 0x5c0   :  { %v579_v46 = vadd.f32 %v578_v44, %v577_v41  ;;  %v570_v47 = vadd.f32 %v569_v45, %v568_v43 }
 0x5c2   :  { %v580_v48 = vrot.slane %v579_v46, 1  ;;  %v571_v49 = vrot.slane %v570_v47, 2 }
 0x5c4   :  { %v581_v51 = vadd.f32 %v580_v48, %v579_v46  ;;  %v572_v52 = vadd.f32 %v571_v49, %v570_v47 }
 0x5c6   :  { %v588_v53 = vadd.f32 %v616_v50, %v581_v51  ;;  %v573_v54 = vrot.slane %v572_v52, 1 }
 0x5c8   :  { %v574_v55 = vadd.f32 %v573_v54, %v572_v52  ;;  %v591_v56 = vrot.slane %v588_v53, 7 }
 0x5ca   :  { %v587_v57 = vadd.f32 %v616_v50, %v574_v55 }
 0x5cc   :  { %v592_v58 = vsel %vm68_vm2, %v591_v56, %v587_v57 }
 0x5cd   :  { %595 = vst.msk [vmem:[%s830_s2] sm:$0x3] %vm594_vm10, %v592_v58 }
 0x5ce   :  { %600 = vsyncpa [#allocation3], 1 }
 0x5cf   :  { %601 = vsyncpa [#allocation5], 1 }

</bundles_post_ra>
